<compile_context>
chip_gen: v6e
topology: v6e:2x2x1
jax: 0.10.0
libtpu: 0.0.40
codegen_flags: <defaults>
</compile_context>

<pallas_src>
import functools

import jax
import jax.numpy as jnp
from jax.experimental import pallas as pl
from jax.experimental.pallas import tpu as pltpu


def _round_up(a, m):
    return ((a + m - 1) // m) * m


def _conv1d_kernel(x_ref, halo_ref, w_ref, b_ref, o_ref, *, K, TL, fold):
    # x_ref:    (1, C_in, TL)         current length tile (already zero padded)
    # halo_ref: (1, 1, C_in, K-1)     first K-1 columns of the next tile
    # w_ref:    (C_out, K*C_in)       folded weights   [fold path]
    #           (K, C_out, C_in)      per-tap weights  [per-tap path]
    # b_ref:    (C_out, 1)
    # o_ref:    (1, C_out, TL)
    x = x_ref[0]                                              # (C_in, TL)
    if K > 1:
        xw = jnp.concatenate([x, halo_ref[0, 0]], axis=1)     # (C_in, TL + K - 1)
    else:
        xw = x
    if fold:
        # Stack the K shifted views along the channel axis and do ONE MXU matmul
        # with contraction dim K*C_in instead of K tiny-contraction matmuls.
        x_cat = jnp.concatenate([xw[:, kk:kk + TL] for kk in range(K)], axis=0)
        acc = jnp.dot(w_ref[...], x_cat, preferred_element_type=jnp.float32)
    else:
        acc = jnp.dot(w_ref[0], xw[:, :TL], preferred_element_type=jnp.float32)
        for kk in range(1, K):
            acc = acc + jnp.dot(w_ref[kk], xw[:, kk:kk + TL],
                                preferred_element_type=jnp.float32)
    o_ref[0] = (acc + b_ref[...]).astype(o_ref.dtype)


def init_projection_forward(x, weight, bias, *, padding, max_tile=512, force_fold=None):
    """Forward pass of InitProjection.

    x:      [B, L, D]  (float32)
    weight: [C_out, C_in, K]  with C_in == D
    bias:   [C_out]
    returns [B, L_out, C_out]  where L_out = L + 2*padding - K + 1
    """
    B, L, D = x.shape
    C_out, C_in, K = weight.shape
    assert C_in == D, "Conv1d in_channels must equal last dim of input (after reshape)"
    L_out = L + 2 * padding - K + 1
    assert L_out >= 1

    # Lane-dense length tile (multiple of 128), capped so VMEM stays small on v7x.
    TL = min(max_tile, _round_up(L_out, 128))
    assert TL % 128 == 0 and K - 1 <= TL
    n_t = pl.cdiv(L_out, TL)
    L_main = n_t * TL

    # PyTorch: x.reshape(B, D, L) -- row-major reshape, NOT a transpose.
    x_ncw = jnp.reshape(x, (B, D, L))

    # One padded copy: `padding` zeros on the left, zeros on the right out to (n_t+1)*TL
    # (covers the Conv1d right padding + lane-dense tile rounding).
    # TODO(synk): this remaining jnp.pad HBM round trip could be removed with in-kernel
    # edge masking / manual element-offset DMA.
    right = (n_t + 1) * TL - padding - L
    x_big = jnp.pad(x_ncw, ((0, 0), (0, 0), (padding, right)))   # (B, C_in, (n_t+1)*TL)

    x_main = x_big[:, :, :L_main]                                # (B, C_in, n_t*TL)

    # halo[b, t] = padded_input[b, :, (t+1)*TL : (t+1)*TL + K - 1]  (tiny side array)
    Kh = max(K - 1, 1)
    halo = jnp.transpose(
        x_big.reshape(B, C_in, n_t + 1, TL)[:, :, 1:, :Kh],      # (B, C_in, n_t, Kh)
        (0, 2, 1, 3))                                            # (B, n_t, C_in, Kh)

    fold = (C_in < 128) if force_fold is None else force_fold
    if fold:
        # (C_out, C_in, K) -> (C_out, K, C_in) -> (C_out, K*C_in); matches the in-kernel
        # stacking order of x_cat. Lane/sublane dense; K never on the 128-lane axis.
        w_kernel = jnp.transpose(weight, (0, 2, 1)).reshape(C_out, K * C_in)
    else:
        # Per-tap layout: w_kernel[kk] is a free first-axis view of (C_out, C_in).
        w_kernel = jnp.transpose(weight, (2, 0, 1))              # (K, C_out, C_in)
    bias_col = bias.reshape(C_out, 1)

    kernel = functools.partial(_conv1d_kernel, K=K, TL=TL, fold=fold)
    w_block = w_kernel.shape
    w_zero = (0,) * len(w_block)

    y_ncw = pl.pallas_call(
        kernel,
        out_shape=jax.ShapeDtypeStruct((B, C_out, L_main), x.dtype),
        grid_spec=pltpu.PrefetchScalarGridSpec(
            num_scalar_prefetch=0,
            grid=(B, n_t),
            in_specs=[
                pl.BlockSpec((1, C_in, TL), lambda b, t: (b, 0, t)),
                pl.BlockSpec((1, 1, C_in, Kh), lambda b, t: (b, t, 0, 0)),
                pl.BlockSpec(w_block, lambda b, t: w_zero),
                pl.BlockSpec((C_out, 1), lambda b, t: (0, 0)),
            ],
            out_specs=pl.BlockSpec((1, C_out, TL), lambda b, t: (b, 0, t)),
        ),
        compiler_params=pltpu.CompilerParams(
            dimension_semantics=("parallel", "parallel")),
        cost_estimate=pl.CostEstimate(
            flops=2 * B * C_out * C_in * K * L_out,
            transcendentals=0,
            bytes_accessed=4 * (B * L * D + C_out * C_in * K + C_out
                                + B * C_out * L_out)),
    )(x_main, halo, w_kernel, bias_col)

    # PyTorch: y.reshape(B, L_out, C_out) -- again a row-major reshape, NOT a transpose.
    return jnp.reshape(y_ncw[:, :, :L_out], (B, L_out, C_out))


def _reference_forward(x, weight, bias, *, padding):
    """Pure-JAX reference matching the PyTorch module semantics."""
    B, L, D = x.shape
    C_out, C_in, K = weight.shape
    x_ncw = jnp.reshape(x, (B, D, L))
    y = jax.lax.conv_general_dilated(
        x_ncw, weight,
        window_strides=(1,),
        padding=[(padding, padding)],
        dimension_numbers=("NCH", "OIH", "NCH"),
    ) + bias[None, :, None]
    L_out = L + 2 * padding - K + 1
    return jnp.reshape(y, (B, L_out, C_out))


if __name__ == "__main__":
    # Small shapes consistent with the module: x is [B, L, D], Conv1d(in=D, out=C_out, K, padding).
    B, L, D = 2, 16, 4
    C_out, K, P = 8, 3, 1

    key = jax.random.PRNGKey(0)
    kx, kw, kb = jax.random.split(key, 3)

    x = jax.random.normal(kx, (B, L, D), dtype=jnp.float32)

    # Deterministic Conv1d-style init: U(-bound, bound), bound = 1/sqrt(C_in*K).
    bound = 1.0 / (D * K) ** 0.5
    weight = jax.random.uniform(kw, (C_out, D, K), dtype=jnp.float32,
                                minval=-bound, maxval=bound)
    bias = jax.random.uniform(kb, (C_out,), dtype=jnp.float32,
                              minval=-bound, maxval=bound)

    ref = _reference_forward(x, weight, bias, padding=P)

    # Default (folded-contraction) path.
    out = init_projection_forward(x, weight, bias, padding=P)
    out = jax.block_until_ready(out)
    assert out.shape == (B, L + 2 * P - K + 1, C_out)
    assert jnp.allclose(out, ref, atol=1e-5, rtol=1e-5), "mismatch vs reference (fold)"

    # Also exercise the per-tap (large-C_in) weight path.
    out2 = jax.block_until_ready(
        init_projection_forward(x, weight, bias, padding=P, force_fold=False))
    assert jnp.allclose(out2, ref, atol=1e-5, rtol=1e-5), "mismatch vs reference (per-tap)"

    print("KERNEL_OK")
</pallas_src>

<mosaic_0001>
module attributes {stable_mosaic.version = 11 : i64} {
  func.func @_conv1d_kernel(%arg0: i32, %arg1: i32, %arg2: memref<1x4x128xf32, #tpu.memory_space<vmem>>, %arg3: memref<1x1x4x2xf32, #tpu.memory_space<vmem>>, %arg4: memref<8x12xf32, #tpu.memory_space<vmem>>, %arg5: memref<8x1xf32, #tpu.memory_space<vmem>>, %arg6: memref<1x8x128xf32, #tpu.memory_space<vmem>>) attributes {dimension_semantics = [#tpu.dimension_semantics<parallel>, #tpu.dimension_semantics<parallel>], iteration_bounds = array<i64: 2, 1>, scalar_prefetch = 0 : i64, scratch_operands = 0 : i64, tpu.core_type = #tpu.core_type<tc>, window_params = [{transform_indices = @transform_0, window_bounds = array<i64: 1, 4, 128>}, {transform_indices = @transform_1, window_bounds = array<i64: 1, 1, 4, 2>}, {pipeline_mode = #tpu.pipeline_mode<synchronous>, transform_indices = @transform_2, window_bounds = array<i64: 8, 12>}, {pipeline_mode = #tpu.pipeline_mode<synchronous>, transform_indices = @transform_3, window_bounds = array<i64: 8, 1>}, {transform_indices = @transform_4, window_bounds = array<i64: 1, 8, 128>}]} {
    %c0 = arith.constant 0 : index
    %c0_0 = arith.constant 0 : index
    %c0_1 = arith.constant 0 : index
    %0 = vector.load %arg2[%c0, %c0_0, %c0_1] : memref<1x4x128xf32, #tpu.memory_space<vmem>>, vector<1x4x128xf32>
    %1 = vector.shape_cast %0 : vector<1x4x128xf32> to vector<4x128xf32>
    %c0_2 = arith.constant 0 : index
    %c0_3 = arith.constant 0 : index
    %c0_4 = arith.constant 0 : index
    %c0_5 = arith.constant 0 : index
    %2 = vector.load %arg3[%c0_2, %c0_3, %c0_4, %c0_5] : memref<1x1x4x2xf32, #tpu.memory_space<vmem>>, vector<1x1x4x2xf32>
    %3 = vector.shape_cast %2 : vector<1x1x4x2xf32> to vector<4x2xf32>
    %4 = tpu.concatenate %1, %3 in 1 : vector<4x128xf32>, vector<4x2xf32> -> vector<4x130xf32>
    %5 = vector.extract_strided_slice %4 {offsets = [0, 0], sizes = [4, 128], strides = [1, 1]} : vector<4x130xf32> to vector<4x128xf32>
    %6 = vector.extract_strided_slice %4 {offsets = [0, 1], sizes = [4, 128], strides = [1, 1]} : vector<4x130xf32> to vector<4x128xf32>
    %7 = vector.extract_strided_slice %4 {offsets = [0, 2], sizes = [4, 128], strides = [1, 1]} : vector<4x130xf32> to vector<4x128xf32>
    %8 = tpu.concatenate %5, %6, %7 in 0 : vector<4x128xf32>, vector<4x128xf32>, vector<4x128xf32> -> vector<12x128xf32>
    %c0_6 = arith.constant 0 : index
    %c0_7 = arith.constant 0 : index
    %9 = vector.load %arg4[%c0_6, %c0_7] : memref<8x12xf32, #tpu.memory_space<vmem>>, vector<8x12xf32>
    %cst = arith.constant dense<0.000000e+00> : vector<8x128xf32>
    %10 = tpu.matmul %9, %8, %cst {dimension_numbers = #tpu.dot_dimension_numbers<[1], [0], [0], [1], [0, 0, 1, 1], [], []>} : vector<8x12xf32>, vector<12x128xf32>, vector<8x128xf32> -> vector<8x128xf32>
    %c0_8 = arith.constant 0 : index
    %c0_9 = arith.constant 0 : index
    %11 = vector.load %arg5[%c0_8, %c0_9] : memref<8x1xf32, #tpu.memory_space<vmem>>, vector<8x1xf32>
    %12 = vector.broadcast %11 : vector<8x1xf32> to vector<8x128xf32>
    %13 = arith.addf %10, %12 : vector<8x128xf32>
    %c0_10 = arith.constant 0 : index
    %c0_11 = arith.constant 0 : index
    %c0_12 = arith.constant 0 : index
    %14 = vector.load %arg6[%c0_10, %c0_11, %c0_12] : memref<1x8x128xf32, #tpu.memory_space<vmem>>, vector<1x8x128xf32>
    %15 = vector.shape_cast %14 : vector<1x8x128xf32> to vector<8x128xf32>
    %16 = vector.shape_cast %13 : vector<8x128xf32> to vector<1x8x128xf32>
    tpu.vector_store %arg6[%c0_10, %c0_11, %c0_12], %16 {strides = array<i32>} : memref<1x8x128xf32, #tpu.memory_space<vmem>>, vector<1x8x128xf32>,
    return
  }
  func.func @transform_0(%arg0: i32, %arg1: i32) -> (i32, i32, i32) {
    %c0_i32 = arith.constant 0 : i32
    %c0_i32_0 = arith.constant 0 : i32
    return %arg0, %c0_i32, %arg1 : i32, i32, i32
  }
  func.func @transform_1(%arg0: i32, %arg1: i32) -> (i32, i32, i32, i32) {
    %c0_i32 = arith.constant 0 : i32
    %c0_i32_0 = arith.constant 0 : i32
    %c0_i32_1 = arith.constant 0 : i32
    return %arg0, %arg1, %c0_i32, %c0_i32_0 : i32, i32, i32, i32
  }
  func.func @transform_2(%arg0: i32, %arg1: i32) -> (i32, i32) {
    %c0_i32 = arith.constant 0 : i32
    %c0_i32_0 = arith.constant 0 : i32
    %c0_i32_1 = arith.constant 0 : i32
    return %c0_i32, %c0_i32_0 : i32, i32
  }
  func.func @transform_3(%arg0: i32, %arg1: i32) -> (i32, i32) {
    %c0_i32 = arith.constant 0 : i32
    %c0_i32_0 = arith.constant 0 : i32
    %c0_i32_1 = arith.constant 0 : i32
    return %c0_i32, %c0_i32_0 : i32, i32
  }
  func.func @transform_4(%arg0: i32, %arg1: i32) -> (i32, i32, i32) {
    %c0_i32 = arith.constant 0 : i32
    %c0_i32_0 = arith.constant 0 : i32
    return %arg0, %c0_i32, %arg1 : i32, i32, i32
  }
}

</mosaic_0001>

<bundles_post_ra>
// kernel: tpu_custom_call.1
= control target key start
LH: loop header
LB: loop body
LE: loop exit
PB: predicated region body
PF: predicated region fallthrough
CT: control target
= control target key end

     0   :  { %9 = vsyncpa [#allocation3], 0  ;;  %s760_s0 = inlined_call_operand.vmem [shape: f32[2,4,128], index: 0, kind: input, shape index: {}]   ;;  %s761_s1 = inlined_call_operand.vmem [shape: f32[2,1,4,2], index: 1, kind: input, shape index: {}]   ;;  %s762_s2 = inlined_call_operand.vmem [shape: f32[8,12], index: 2, kind: input, shape index: {}]   ;;  %s763_s3 = inlined_call_operand.vmem [shape: f32[8,1], index: 3, kind: input, shape index: {}]   ;;  %s764_s4 = inlined_call_operand.hbm [shape: f32[2,8,128], index: 4, kind: output, shape index: {}]  }
   0x1   :  { %11 = vsyncpa [#allocation3 + $0x1], 0  ;;  %s646_s15 = smov 0   ;;  %s648_s16 = smov 0  }
   0x2   :  { %s650_s17 = smov 0   ;;  %s652_s18 = smov 0  }
   0x3   :  { %s654_s19 = smov 0   ;;  %s656_s20 = smov 0  }
   0x4 LB: > { %s452_s21 = sadd.s32 4294967295, %s613_s20   ;;  %s453_s22 = sadd.s32 4294967294, %s613_s20   ;;  %s613_s20 = sphi %s656_s20, %s17_s20   ;;  %s609_s19 = sphi %s654_s19, %s771_s19   ;;  %s605_s18 = sphi %s652_s18, %s770_s18   ;;  %s601_s17 = sphi %s650_s17, %s769_s17   ;;  %s597_s16 = sphi %s648_s16, %s768_s16   ;;  %s593_s15 = sphi %s646_s15, %s767_s15  }
   0x5   : > { %s29_s23 = sadd.s32 1, %s609_s19  ;;  %s136_s24 = sadd.s32 1, %s601_s17 }
   0x6   : > { %p31_p0 = scmp.ge.s32.totalorder %s29_s23, 2  ;;  %p146_p1 = scmp.ne.s32.totalorder %s601_s17, %s597_s16 }
   0x7   : > { %p147_p2 = scmp.eq.s32.totalorder %s452_s21, 1  ;;  %p152_p3 = scmp.ne.s32.totalorder %s597_s16, %s593_s15 }
   0x8   : > { %s773_s23 = smov (%p31_p0, %s29_s23), 0  ;;  %p153_p5 = scmp.eq.s32.totalorder %s453_s22, 1 }
   0x9   : > { %p686_p4 = por %p147_p2, %p146_p1  ;;  %s131_s26 = ssub.s32 %s609_s19, %s773_s23 }
   0xa   : > { %p456_p6 = scmp.ge.s32.totalorder %s613_s20, 1  ;;  %p134_p7 = scmp.eq.s32.totalorder %s131_s26, 0 }
   0xb   : > { %p693_p8 = por %p153_p5, %p152_p3  ;;  %p197_p9 = scmp.lt.s32.totalorder %s613_s20, 3 }
   0xc   : > { %s699_s28 = scalar_select %p134_p7, %s601_s17, %s136_s24  }
   0xd   : > { %p198_p10 = pnand %p456_p6, %p197_p9 }
   0xe   : > { %p232_p11 = scmp.lt.s32.totalorder (!%p198_p10), %s605_s18, 1  ;;  %s618_s11 = smov (!%p198_p10), 126  }
   0xf   : > { %201 = sbr.rel (%p198_p10) target bundleno = 357 (0x165), region = 36  ;;  %s619_s12 = smov (!%p198_p10), 127  }
  0x10   : > { %s229_s24 = sand.u32 (!%p198_p10), 1, %s597_s16  }
  0x11   : > { %s457_s26 = sshll.u32 (!%p198_p10), %s229_s24, 3  ;;  %s352_s9 = scalar_lea.sflag (!%p198_p10), [#allocation3], %s229_s24 }
  0x14   : > { %v615_v0 = vmov 0.0   ;;  %s233_s29 = scalar_select %p232_p11, %s605_s18, 1  ;;  %vm616_vm0 = vmmov 0   ;;  %v617_v1 = vmov 0   ;;  %v268_v6 = vld [vmem:[%s763_s3] sm:$0xff]  ;;  %vm263_vm1 = vcmask 1031168  }
  0x15   : > { %469 = vmatprep.subr.mxu0 %v615_v0  ;;  %473 = vmatprep.mubr.msk.f32.mxu0 %vm616_vm0, %v615_v0  ;;  %vm265_vm2 = vcmask 1043456   ;;  %vm256_vm3 = vcmask 1039360   ;;  %v267_v13 = vld [vmem:[%s762_s2] sm:$0xff]  ;;  %vm274_vm4 = vcmask 97280  }
  0x16   : > { %s458_s30 = sshll.u32 %s233_s29, 2  ;;  %536 = vset.pattern.permute.xlu0 %v617_v1  ;;  %s463_s29 = sshll.u32 %s605_s18, 7 }
  0x17   : > { %s238_s7 = scalar_lea.vmem %s760_s0, %s458_s30  ;;  %s245_s10 = scalar_lea.vmem %s761_s1, %s458_s30 }
  0x18   : > { %v246_v2 = vld [vmem:[%s238_s7] sm:$0xf]  ;;  %s231_s30 = scalar_lea.vmem [#allocation2], %s457_s26  ;;  %s720_s8 = scalar_lea.hbm %s764_s4, %s463_s29 }
  0x19   : > { %v247_v3 = vld [vmem:[%s245_s10] sm:$0xf]  ;;  %259 = vrot.lane.b32.xlu0 %v246_v2, %s618_s11  ;;  %v250_v4 = vrot.slane %v246_v2, 4  ;;  %s366_s5 = sshll.u32 %s231_s30, 4  ;;  %s367_s5 = int_to_ptr.vmem [resolvable:$true] %s366_s5 }
  0x1a   : > { %v251_v5 = vrot.slane %v247_v3, 4  ;;  %s537_s10 = scalar_lea.vmem %s367_s5, 128 }
  0x1b   : > { %252 = vrot.lane.b32.xlu1 %v250_v4, %s619_s12  ;;  %p538_p12 = scmp.ne.s32.totalorder %s367_s5, %s537_s10 }
  0x1d   : > { %261 = vrot.lane.b32.xlu0 %v247_v3, %s618_s11  ;;  %p539_p13 = pnand %p538_p12, %p686_p4  ;;  %s620_s11 = smov [#allocation2]  }
  0x1e   : > { %s541_s18 = sshll.u32 %s620_s11, 4  ;;  %s542_s18 = int_to_ptr.vmem [resolvable:$false] %s541_s18 }
  0x1f   : > { %254 = vrot.lane.b32.xlu1 %v251_v5, %s619_s12  ;;  %p540_p0 = pneg %p539_p13  ;;  %s543_s12 = scalar_lea.vmem %s542_s18, 256 }
  0x20   : > { %p544_p1 = scmp.lt.s32.totalorder %s367_s5, %s542_s18  ;;  %p545_p2 = scmp.lt.s32.totalorder %s543_s12, %s537_s10 }
  0x21   : > { %271 = vperm.xlu0 %536, %v268_v6  }
  0x22   : > { %p546_p3 = por %p545_p2, %p544_p1 }
  0x24   : > { %p547_p5 = pnand %p546_p3, %p540_p0 }
  0x8b   : > { %v260_v7 = vpop.permute.xlu0 %259 }
  0x8d   : > { %v253_v8 = vpop.permute.xlu1 %252 }
  0x8f   : > { %v262_v9 = vpop.permute.xlu0 %261 }
  0x90   : > { %v264_v10 = vsel %vm263_vm1, %v260_v7, %v262_v9 }
  0x91   : > { %470 = vmatpush3.msk.msra.mxu0 %vm265_vm2, %v264_v10  ;;  %v255_v11 = vpop.permute.xlu1 %254 }
  0x92   : > { %v257_v12 = vsel %vm256_vm3, %v253_v8, %v255_v11  ;;  %471 = vmatprep.subr.mxu0 %v615_v0 }
  0x93   : > { %v266_v14 = vsel %vm265_vm2, %v246_v2, %v257_v12 }
  0x94   : > { %472 = vmatpush3.msra.mxu0 %v266_v14 }
  0x95   : > { %474 = vmatmul.mubr.msk.f32.vlgmr.msra.gmra.mxu0 %vm274_vm4, %v267_v13 }
  0x9c   : > { %v272_v15 = vpop.permute.xlu0 %271 }
 0x155   : > { %v346_v16 = vpop.f32.mrf.mxu0 }
 0x156   : > { %v347_v17 = vadd.f32 %v346_v16, %v272_v15 }
 0x157   : > { %v475_v18 = vpop.f32.mrf.mxu0 }
 0x158   : > { %350 = vst [vmem:[%s231_s30] sm:$0xff] %v347_v17 }
 0x159   : > { %550 = shalt.err (!%p547_p5)
}
 0x15a   : > { %s551_s13 = scalar_lea.hbm %s720_s8, 128  ;;  %s555_s22 = scalar_lea.hbm %s764_s4, 256 }
 0x15b   : > { %p552_p6 = scmp.ne.s32.totalorder %s720_s8, %s551_s13  ;;  %p556_p10 = scmp.lt.s32.totalorder %s720_s8, %s764_s4 }
 0x15c   : > { %p557_p11 = scmp.lt.s32.totalorder %s555_s22, %s551_s13 }
 0x15d   : > { %p553_p7 = pnand %p552_p6, %p686_p4 }
 0x15e   : > { %p558_p12 = por %p557_p11, %p556_p10 }
 0x15f   : > { %p554_p9 = pneg %p553_p7 }
 0x161   : > { %p559_p13 = pnand %p558_p12, %p554_p9 }
 0x163   : > { %562 = shalt.err (!%p559_p13)
}
 0x164   : > { %476 = dma.vmem_to_hbm [thread:$0]  (%p686_p4), %s367_s5, 128, %s720_s8, %s352_s9  }
 0x165 PF: > { %p482_p0 = scmp.ge.s32.totalorder %s613_s20, 2  ;;  %s378_s29 = sand.u32 1, %s593_s15  }
 0x166   : > { %s379_s30 = scalar_lea.sflag [#allocation3], %s378_s29 }
 0x167   : > { %p479_p1 = pnand %p482_p0, %p693_p8 }
 0x169   : > { %p480_p2 = pneg %p479_p1 }
 0x16b   : > { %588 = dma.done.wait (%p480_p2), %s379_s30, 128  }
 0x16c   : > { %590 = vsyncadd (%p480_p2), %s379_s30, 4294967168  ;;  %s17_s20 = sadd.s32 1, %s613_s20   ;;  %s767_s15 = smov %s597_s16 }
 0x16d   : > { %p14_p3 = scmp.ge.s32.totalorder %s17_s20, 4   ;;  %s768_s16 = smov %s601_s17 }
 0x16e   : > { %s769_s17 = smov %s699_s28  ;;  %s770_s18 = smov %s609_s19 }
 0x16f   : > { %s771_s19 = smov %s773_s23  ;;  %16 = sbr.rel (!%p14_p3) target bundleno = 4 (0x4), region = 74 }
 0x174   :  { %384 = vsyncpa [#allocation3], 1 }
 0x175   :  { %386 = vsyncpa [#allocation3 + $0x1], 1 }

</bundles_post_ra>
